<compile_context>
chip_gen: v7x
topology: tpu7x:2x2x1
jax: 0.10.0
libtpu: 0.0.40
codegen_flags: <defaults>
</compile_context>

<pallas_src>
import functools
import math

import jax
import jax.numpy as jnp
import numpy as np
from jax import lax
from jax.experimental import pallas as pl
from jax.experimental.pallas import tpu as pltpu


# ----------------------------- Pallas kernel ------------------------------- #
def _hyper_kernel(rays_ref, sp_ref, wh_ref, out_ref, *, ha):
    """Whole LeNetHyper forward for a batch of rays.

    rays_ref : (B, 8)  f32  -- [r0, r1, 1, 0, 0, 0, 0, 0] per row
    sp_ref   : (8 + 2*ha, ha) f32 -- packed ray-MLP params (biases folded,
               ones-carrier in lane ha-1):
                 rows 0:8        layer-1 block  (w1 rows, b1, 1.0 carrier)
                 rows 8:8+ha     layer-2 block  (w2^T, b2, carrier)
                 rows 8+ha:8+2ha layer-3 block  (w3^T, b3, carrier)
    wh_ref   : (ha, T_pad) bf16 -- all head Linears fused; row ha-1 = biases
    out_ref  : (B, T_pad) f32
    """
    # ray_mlp layer 1 (bias folded):  relu((B,8) @ (8,ha))
    h = jnp.maximum(
        jnp.dot(rays_ref[...], sp_ref[0:8, :],
                preferred_element_type=jnp.float32), 0.0)
    # ray_mlp layer 2:  relu((B,ha) @ (ha,ha))
    h = jnp.maximum(
        jnp.dot(h, sp_ref[8:8 + ha, :],
                preferred_element_type=jnp.float32), 0.0)
    # ray_mlp layer 3 (no relu) -> feats, with feats[:, ha-1] == 1.0 carrier.
    feats = jnp.dot(h, sp_ref[8 + ha:8 + 2 * ha, :],
                    preferred_element_type=jnp.float32)
    # All head Linears fused into one bf16 matmul, f32 accumulation; the
    # T_pad lane dim is a multiple of 256 -> lane-dense unmasked stores.
    out_ref[...] = jnp.dot(feats.astype(jnp.bfloat16), wh_ref[...],
                           preferred_element_type=jnp.float32)


# ------------------------------ host wrapper ------------------------------- #
def _linear_init(key, in_dim, out_dim):
    """Deterministic PyTorch-default-style init: U(-1/sqrt(in), 1/sqrt(in))."""
    kw, kb = jax.random.split(key)
    bound = 1.0 / math.sqrt(in_dim)
    w = jax.random.uniform(kw, (out_dim, in_dim), jnp.float32, -bound, bound)
    b = jax.random.uniform(kb, (out_dim,), jnp.float32, -bound, bound)
    return w, b


class LeNetHyperPallas:
    """JAX/Pallas re-implementation of LeNetHyper.forward (batched + single)."""

    def __init__(self, kernel_size, ray_hidden_dim=32, out_dim=10,
                 target_hidden_dim=16, n_kernels=4, n_conv_layers=2,
                 n_hidden=1, n_tasks=2, key=None):
        assert len(kernel_size) == n_conv_layers
        if key is None:
            key = jax.random.PRNGKey(0)
        H = ray_hidden_dim
        self.H = H
        keys = iter(jax.random.split(key, 32))

        # ---- raw (PyTorch-layout) parameters, kept for the pure-JAX ref ----
        self.w1, self.b1 = _linear_init(next(keys), 2, H)
        self.w2, self.b2 = _linear_init(next(keys), H, H)
        self.w3, self.b3 = _linear_init(next(keys), H, H)

        # Head output sizes, in the exact order produced by the PyTorch forward.
        latent = 25
        head_names, head_sizes = [], []
        head_names += ["conv0.weights", "conv0.bias"]
        head_sizes += [n_kernels * kernel_size[0] * kernel_size[0], n_kernels]
        for i in range(1, n_conv_layers):
            p = 2 ** (i - 1) * n_kernels
            c = 2 ** i * n_kernels
            head_names += [f"conv{i}.weights", f"conv{i}.bias"]
            head_sizes += [c * p * kernel_size[i] * kernel_size[i], c]
        i_last = n_conv_layers - 1
        for j in range(n_hidden):   # reference module defines hidden_0 only
            head_names += [f"hidden{j}.weights", f"hidden{j}.bias"]
            head_sizes += [target_hidden_dim * 2 ** i_last * n_kernels * latent,
                           target_hidden_dim]
        for j in range(n_tasks):
            head_names += [f"task{j}.weights", f"task{j}.bias"]
            head_sizes += [target_hidden_dim * out_dim, out_dim]
        self.head_names = tuple(head_names)
        self.head_sizes = tuple(head_sizes)

        # Raw per-head params (for the pure-JAX reference).
        self._head_w, self._head_b = [], []
        for sz in self.head_sizes:
            w, b = _linear_init(next(keys), H, sz)
            self._head_w.append(w)
            self._head_b.append(b)

        # ---- kernel-layout parameters, precomputed ONCE --------------------
        # Augmented hidden width: H real lanes + 1 "ones-carrier" lane, padded
        # up to a multiple of 8 sublanes for aligned static slicing.
        ha = int(pl.cdiv(H + 1, 8) * 8)
        self.ha = ha
        carrier = ha - 1

        # Packed small-parameter buffer: (8 + 2*ha, ha) f32, biases folded.
        w1_t = np.asarray(self.w1.T)   # (2, H)
        blk1 = np.zeros((8, ha), np.float32)
        blk1[0, :H] = w1_t[0]
        blk1[1, :H] = w1_t[1]
        blk1[2, :H] = np.asarray(self.b1)
        blk1[2, carrier] = 1.0                       # ones-carrier source

        blk2 = np.zeros((ha, ha), np.float32)
        blk2[:H, :H] = np.asarray(self.w2.T)
        blk2[carrier, :H] = np.asarray(self.b2)
        blk2[carrier, carrier] = 1.0                 # propagate carrier

        blk3 = np.zeros((ha, ha), np.float32)
        blk3[:H, :H] = np.asarray(self.w3.T)
        blk3[carrier, :H] = np.asarray(self.b3)
        blk3[carrier, carrier] = 1.0                 # feats carrier == 1.0

        sp = np.concatenate([blk1, blk2, blk3], axis=0)        # (8+2*ha, ha)

        # Fused head weights (bias folded into row `carrier`), bf16, lane dim
        # padded to a multiple of 256 (v6e/v7x MXU tile width).
        self.t_total = int(sum(self.head_sizes))
        self.t_pad = int(pl.cdiv(self.t_total, 256) * 256)
        wh = np.zeros((ha, self.t_pad), np.float32)
        off = 0
        for w, b in zip(self._head_w, self._head_b):
            sz = w.shape[0]
            wh[:H, off:off + sz] = np.asarray(w.T)
            wh[carrier, off:off + sz] = np.asarray(b)
            off += sz

        self.params = {
            "sp": jnp.asarray(sp, jnp.float32),
            "wh": jnp.asarray(wh, jnp.bfloat16),
        }

        t_pad = self.t_pad
        head_meta = tuple(zip(self.head_names, self.head_sizes))
        vmem = pltpu.MemorySpace.VMEM
        sp_bytes = int(sp.size) * 4
        wh_bytes = int(wh.size) * 2

        def forward(rays, params):
            """Primary batched path: (B, 2) rays -> dict of (B, sz) arrays."""
            rays = jnp.asarray(rays, jnp.float32).reshape(-1, 2)
            b = rays.shape[0]
            b_pad = int(pl.cdiv(max(b, 1), 8) * 8)
            # Augmented ray block [r0, r1, 1, 0...]; layer-1 bias is folded in.
            rays_aug = jnp.zeros((b_pad, 8), jnp.float32)
            rays_aug = rays_aug.at[:b, 0:2].set(rays)
            rays_aug = rays_aug.at[:, 2].set(1.0)

            flops = int(2 * b_pad * (8 * ha + 2 * ha * ha + ha * t_pad))
            bytes_accessed = int(b_pad * 8 * 4 + sp_bytes + wh_bytes
                                 + b_pad * t_pad * 4)
            out = pl.pallas_call(
                functools.partial(_hyper_kernel, ha=ha),
                out_shape=jax.ShapeDtypeStruct((b_pad, t_pad), jnp.float32),
                in_specs=[pl.BlockSpec(memory_space=vmem)] * 3,
                out_specs=pl.BlockSpec(memory_space=vmem),
                cost_estimate=pl.CostEstimate(flops=flops, transcendentals=0,
                                              bytes_accessed=bytes_accessed),
            )(rays_aug, params["sp"], params["wh"])
            # Static-offset slicing into the per-head dict (fused in this jit).
            out_dict = {}
            off = 0
            for name, sz in head_meta:
                out_dict[name] = lax.slice(out, (0, off), (b, off + sz))
                off += sz
            return out_dict

        # Single XLA dispatch per call: pallas_call + all output slicing.
        self._forward = jax.jit(forward)

    # ---- batched Pallas forward ------------------------------------------ #
    def forward_batch(self, rays):
        """rays: (B, 2) -> dict of (B, head_size) arrays."""
        return self._forward(rays, self.params)

    # ---- single-ray forward (original module interface) ------------------- #
    def __call__(self, ray):
        ray2d = jnp.asarray(ray, jnp.float32).reshape(1, 2)
        out_b = self._forward(ray2d, self.params)
        return {name: v[0] for name, v in out_b.items()}   # 1-D per head

    # ---- pure-JAX f32 reference (for correctness check) ------------------- #
    def _reference_feats(self, rays2d):
        h = jnp.maximum(rays2d @ self.w1.T + self.b1, 0.0)
        h = jnp.maximum(h @ self.w2.T + self.b2, 0.0)
        return h @ self.w3.T + self.b3

    def reference_batch(self, rays):
        x = jnp.asarray(rays, jnp.float32).reshape(-1, 2)
        feats = self._reference_feats(x)
        return {name: feats @ w.T + b
                for name, w, b in zip(self.head_names, self._head_w,
                                      self._head_b)}

    def reference(self, ray):
        out_b = self.reference_batch(jnp.asarray(ray, jnp.float32).reshape(1, 2))
        return {name: v[0] for name, v in out_b.items()}


if __name__ == "__main__":
    key = jax.random.PRNGKey(0)
    k_param, k_ray = jax.random.split(key)

    # Small hyperparameters consistent with the module's __init__.
    model = LeNetHyperPallas(
        kernel_size=[3, 3],
        ray_hidden_dim=32,
        out_dim=10,
        target_hidden_dim=16,
        n_kernels=4,
        n_conv_layers=2,
        n_hidden=1,
        n_tasks=2,
        key=k_param,
    )

    # A small batch of preference "rays" on the 2-simplex (PHN-style).
    r = jax.random.uniform(k_ray, (4, 2), jnp.float32)
    rays = r / jnp.sum(r, axis=1, keepdims=True)

    # Batched path (primary).
    out_b = model.forward_batch(rays)
    jax.block_until_ready(out_b)
    ref_b = model.reference_batch(rays)
    for name in model.head_names:
        np.testing.assert_allclose(np.asarray(out_b[name]),
                                   np.asarray(ref_b[name]),
                                   rtol=2e-2, atol=2e-2)

    # Single-ray path (original module interface).
    ray = rays[0]
    out = model(ray)
    jax.block_until_ready(out)
    ref = model.reference(ray)
    for name in model.head_names:
        np.testing.assert_allclose(np.asarray(out[name]),
                                   np.asarray(ref[name]),
                                   rtol=2e-2, atol=2e-2)

    print("KERNEL_OK")
</pallas_src>

<mosaic_0001>
module attributes {stable_mosaic.version = 11 : i64} {
  func.func @_hyper_kernel(%arg0: memref<8x8xf32, #tpu.memory_space<vmem>>, %arg1: memref<88x40xf32, #tpu.memory_space<vmem>>, %arg2: memref<40x4096xbf16, #tpu.memory_space<vmem>>, %arg3: memref<8x4096xf32, #tpu.memory_space<vmem>>) attributes {dimension_semantics = [], scalar_prefetch = 0 : i64, scratch_operands = 0 : i64, tpu.core_type = #tpu.core_type<tc>} {
    %c0 = arith.constant 0 : index
    %c0_0 = arith.constant 0 : index
    %0 = vector.load %arg0[%c0, %c0_0] : memref<8x8xf32, #tpu.memory_space<vmem>>, vector<8x8xf32>
    %c0_1 = arith.constant 0 : index
    %c0_2 = arith.constant 0 : index
    %1 = vector.load %arg1[%c0_1, %c0_2] : memref<88x40xf32, #tpu.memory_space<vmem>>, vector<8x40xf32>
    %cst = arith.constant dense<0.000000e+00> : vector<8x40xf32>
    %2 = tpu.matmul %0, %1, %cst {dimension_numbers = #tpu.dot_dimension_numbers<[1], [0], [0], [1], [0, 0, 1, 1], [], []>} : vector<8x8xf32>, vector<8x40xf32>, vector<8x40xf32> -> vector<8x40xf32>
    %cst_3 = arith.constant 0.000000e+00 : f32
    %3 = vector.broadcast %cst_3 : f32 to vector<8x40xf32>
    %4 = arith.maximumf %2, %3 : vector<8x40xf32>
    %c8 = arith.constant 8 : index
    %c0_4 = arith.constant 0 : index
    %5 = vector.load %arg1[%c8, %c0_4] : memref<88x40xf32, #tpu.memory_space<vmem>>, vector<40x40xf32>
    %cst_5 = arith.constant dense<0.000000e+00> : vector<8x40xf32>
    %6 = tpu.matmul %4, %5, %cst_5 {dimension_numbers = #tpu.dot_dimension_numbers<[1], [0], [0], [1], [0, 0, 1, 1], [], []>} : vector<8x40xf32>, vector<40x40xf32>, vector<8x40xf32> -> vector<8x40xf32>
    %cst_6 = arith.constant 0.000000e+00 : f32
    %7 = vector.broadcast %cst_6 : f32 to vector<8x40xf32>
    %8 = arith.maximumf %6, %7 : vector<8x40xf32>
    %c48 = arith.constant 48 : index
    %c0_7 = arith.constant 0 : index
    %9 = vector.load %arg1[%c48, %c0_7] : memref<88x40xf32, #tpu.memory_space<vmem>>, vector<40x40xf32>
    %cst_8 = arith.constant dense<0.000000e+00> : vector<8x40xf32>
    %10 = tpu.matmul %8, %9, %cst_8 {dimension_numbers = #tpu.dot_dimension_numbers<[1], [0], [0], [1], [0, 0, 1, 1], [], []>} : vector<8x40xf32>, vector<40x40xf32>, vector<8x40xf32> -> vector<8x40xf32>
    %11 = arith.truncf %10 : vector<8x40xf32> to vector<8x40xbf16>
    %c0_9 = arith.constant 0 : index
    %c0_10 = arith.constant 0 : index
    %12 = vector.load %arg2[%c0_9, %c0_10] : memref<40x4096xbf16, #tpu.memory_space<vmem>>, vector<40x4096xbf16>
    %cst_11 = arith.constant dense<0.000000e+00> : vector<8x4096xf32>
    %13 = tpu.matmul %11, %12, %cst_11 {dimension_numbers = #tpu.dot_dimension_numbers<[1], [0], [0], [1], [0, 0, 1, 1], [], []>} : vector<8x40xbf16>, vector<40x4096xbf16>, vector<8x4096xf32> -> vector<8x4096xf32>
    %c0_12 = arith.constant 0 : index
    %c0_13 = arith.constant 0 : index
    %14 = vector.load %arg3[%c0_12, %c0_13] : memref<8x4096xf32, #tpu.memory_space<vmem>>, vector<8x4096xf32>
    tpu.vector_store %arg3[%c0_12, %c0_13], %13 {strides = array<i32>} : memref<8x4096xf32, #tpu.memory_space<vmem>>, vector<8x4096xf32>,
    return
  }
}

</mosaic_0001>

<bundles_post_ra>
// kernel: forward.1
= control target key start
LH: loop header
LB: loop body
LE: loop exit
PB: predicated region body
PF: predicated region fallthrough
CT: control target
= control target key end

     0   :  { %8 = vsyncpa [#allocation3], 0  ;;  %s1789_s12 = smov [#allocation2]   ;;  %s2047_s0 = inlined_call_operand.vmem [shape: f32[8,8], index: 0, kind: input, shape index: {}]   ;;  %s2048_s1 = inlined_call_operand.vmem [shape: f32[88,40], index: 1, kind: input, shape index: {}]   ;;  %s2049_s2 = inlined_call_operand.hbm [shape: bf16[40,4096], index: 2, kind: input, shape index: {}]   ;;  %s2050_s3 = inlined_call_operand.vmem [shape: f32[8,4096], index: 3, kind: output, shape index: {}]  }
   0x1   :  { %s18_s13 = sshll.u32 %s1789_s12, 4  ;;  %s1765_s16 = scalar_lea.hbm %s2049_s2, 10240  ;;  %s19_s13 = int_to_ptr.vmem [resolvable:$true] %s18_s13 }
   0x2   :  { %p1766_p0 = scmp.ne.s32.totalorder %s2049_s2, %s1765_s16  ;;  %p1769_p1 = scmp.lt.u32.totalorder %s1765_s16, %s2049_s2 }
   0x4   :  { %p1771_p2 = pnand %p1769_p1, %p1766_p0 }
   0x6   :  { %1774 = shalt.err (!%p1771_p2)
}
   0x7   :  { %s1775_s21 = scalar_lea.vmem %s19_s13, 10240  ;;  %p1780_p4 = scmp.lt.s32.totalorder %s19_s13, %s19_s13 }
   0x8   :  { %p1776_p3 = scmp.ne.s32.totalorder %s19_s13, %s1775_s21  ;;  %p1781_p5 = scmp.lt.s32.totalorder %s1775_s21, %s1775_s21 }
   0xa   :  { %p1782_p6 = por %p1781_p5, %p1780_p4 }
   0xc   :  { %p1783_p7 = pnand %p1782_p6, %p1776_p3 }
   0xe   :  { %1786 = shalt.err (!%p1783_p7)
}
   0xf   :  { %s1790_s22 = smov 2048   ;;  %s1791_s23 = smov 128  }
  0x10   :  { %24 = dma.hbm_to_vmem [thread:$0]  %s2049_s2, 10240, %s19_s13, [#allocation3], %s1790_s22, %s1790_s22, %s1791_s23  }
  0x11   :  { %1787 = dma.done.wait [#allocation3], 10240  }
  0x12   :  { %1788 = vsyncadd [#allocation3], 4294957056  ;;  %v1792_v0 = vmov 0.0   ;;  %vm1793_vm0 = vmmov 0   ;;  %v1794_v1 = vmov 0.0|0.0   ;;  %vm31_vm1 = vcmask 64512  }
  0x13   :  { %1683 = vmatprep.subr.mxu0 %v1792_v0  ;;  %1685 = vmatprep.mubr.msk.f32.mxu0 %vm1793_vm0, %v1792_v0  ;;  %v30_v2 = vld [vmem:[%s2048_s1] sm:$0xff]  ;;  %v106_v4 = vld [vmem:[%s2048_s1 + $0x8] sm:$0xff]  ;;  %v107_v5 = vld [vmem:[%s2048_s1 + $0x10] sm:$0xff]  ;;  %vm111_vm2 = vcmask 326656   ;;  %vm748_vm3 = vcmask 1043456   ;;  %v1795_v56 = vmov 0  }
  0x14   :  { %1714 = vmatprep.subr.bf16.mxu1 %v1794_v1  ;;  %1698 = vmatprep.mubr.msk.f32.mxu1 %vm1793_vm0, %v1792_v0  ;;  %v29_v3 = vld [vmem:[%s2047_s0] sm:$0xff]  ;;  %v108_v6 = vld [vmem:[%s2048_s1 + $0x18] sm:$0xff]  ;;  %v1715_v8 = vpack.c.bf16 %v107_v5, %v106_v4  ;;  %v110_v10 = vld [vmem:[%s2048_s1 + $0x28] sm:$0xff] }
  0x15   :  { %1684 = vmatpush3.msra.mxu0 %v30_v2  ;;  %v109_v7 = vld [vmem:[%s2048_s1 + $0x20] sm:$0xff]  ;;  %v186_v11 = vld [vmem:[%s2048_s1 + $0x30] sm:$0xff]  ;;  %v187_v12 = vld [vmem:[%s2048_s1 + $0x38] sm:$0xff] }
  0x16   :  { %1686 = vmatmul.mubr.msk.f32.vlgmr.msra.gmra.mrb[0].mxu0 %vm31_vm1, %v29_v3  ;;  %1720 = vmatprep.subr.bf16.mxu0 %v1794_v1  ;;  %v1718_v9 = vpack.c.bf16 %v109_v7, %v108_v6  ;;  %v188_v13 = vld [vmem:[%s2048_s1 + $0x40] sm:$0xff]  ;;  %v1721_v14 = vpack.c.bf16 %v187_v12, %v186_v11  ;;  %v189_v15 = vld [vmem:[%s2048_s1 + $0x48] sm:$0xff]  ;;  %v190_v20 = vld [vmem:[%s2048_s1 + $0x50] sm:$0xff] }
  0x17   :  { %1711 = vmatprep.mubr.msk.f32.mxu0 %vm1793_vm0, %v1792_v0  ;;  %1716 = vmatpush3.bf16.msra.mxu1 %v1715_v8  ;;  %v1724_v16 = vpack.c.bf16 %v189_v15, %v188_v13  ;;  %v265_v21 = vld [vmem:[#allocation2] sm:$0xff]  ;;  %v266_v23 = vld [vmem:[#allocation2 + $0x8] sm:$0xff]  ;;  %v267_v48 = vld [vmem:[#allocation2 + $0x10] sm:$0xff] }
  0x18   :  { %1717 = vmatprep.subr.bf16.mxu1 %v1794_v1  ;;  %1722 = vmatpush3.bf16.msra.mxu0 %v1721_v14  ;;  %v281_v22 = vld [vmem:[#allocation2 + $0x80] sm:$0xff]  ;;  %v282_v26 = vld [vmem:[#allocation2 + $0x88] sm:$0xff]  ;;  %v283_v49 = vld [vmem:[#allocation2 + $0x90] sm:$0xff] }
  0x19   :  { %1723 = vmatprep.subr.bf16.mxu0 %v1794_v1  ;;  %v1541_v24 = vcombine.low %v265_v21, %v281_v22  ;;  %v1542_v25 = vcombine.high %v265_v21, %v281_v22  ;;  %v297_v27 = vld [vmem:[#allocation2 + $0x100] sm:$0xff]  ;;  %v1543_v29 = vcombine.low %v266_v23, %v282_v26  ;;  %v1544_v30 = vcombine.high %v266_v23, %v282_v26  ;;  %v298_v37 = vld [vmem:[#allocation2 + $0x108] sm:$0xff]  ;;  %v268_v50 = vld [vmem:[#allocation2 + $0x18] sm:$0xff] }
  0x1a   :  { %v313_v28 = vld [vmem:[#allocation2 + $0x180] sm:$0xff]  ;;  %v314_v38 = vld [vmem:[#allocation2 + $0x188] sm:$0xff]  ;;  %v1546_v51 = vcombine.high %v267_v48, %v283_v49  ;;  %v284_v52 = vld [vmem:[#allocation2 + $0x98] sm:$0xff]  ;;  %v1545_v53 = vcombine.low %v267_v48, %v283_v49 }
  0x1b   :  { %1719 = vmatpush3.bf16.msra.mxu1 %v1718_v9  ;;  %v1574_v31 = vcombine.high %v297_v27, %v313_v28  ;;  %v1573_v32 = vcombine.low %v297_v27, %v313_v28  ;;  %v329_v33 = vld [vmem:[#allocation2 + $0x200] sm:$0xff]  ;;  %v1576_v42 = vcombine.high %v298_v37, %v314_v38  ;;  %v330_v43 = vld [vmem:[#allocation2 + $0x208] sm:$0xff]  ;;  %v1575_v44 = vcombine.low %v298_v37, %v314_v38  ;;  %v299_v57 = vld [vmem:[#allocation2 + $0x110] sm:$0xff] }
  0x1c   :  { %1696 = vmatprep.subr.mxu1 %v1792_v0  ;;  %1725 = vmatpush3.bf16.msra.mxu0 %v1724_v16  ;;  %v1606_v34 = vcombine.high %v329_v33, %v329_v33  ;;  %v1605_v35 = vcombine.low %v329_v33, %v329_v33  ;;  %v1608_v45 = vcombine.high %v330_v43, %v330_v43  ;;  %v315_v58 = vld [vmem:[#allocation2 + $0x190] sm:$0xff]  ;;  %v300_v59 = vld [vmem:[#allocation2 + $0x118] sm:$0xff]  ;;  %v285_v11 = vld [vmem:[#allocation2 + $0xa0] sm:$0xff] }
  0x1d   :  { %1709 = vmatprep.subr.mxu0 %v1792_v0  ;;  %v1607_v46 = vcombine.low %v330_v43, %v330_v43  ;;  %v1547_v54 = vcombine.low %v268_v50, %v284_v52  ;;  %v1548_v55 = vcombine.high %v268_v50, %v284_v52  ;;  %v316_v60 = vld [vmem:[#allocation2 + $0x198] sm:$0xff]  ;;  %v1578_v0 = vcombine.high %v299_v57, %v315_v58  ;;  %v331_v2 = vld [vmem:[#allocation2 + $0x210] sm:$0xff]  ;;  %v270_v12 = vld [vmem:[#allocation2 + $0x28] sm:$0xff] }
  0x1e   :  { %v750_v36 = vsel %vm748_vm3, %v1605_v35, 0  ;;  %v1580_v1 = vcombine.high %v300_v59, %v316_v60  ;;  %v332_v3 = vld [vmem:[#allocation2 + $0x218] sm:$0xff]  ;;  %v1577_v4 = vcombine.low %v299_v57, %v315_v58  ;;  %v1579_v5 = vcombine.low %v300_v59, %v316_v60  ;;  %v286_v13 = vld [vmem:[#allocation2 + $0xa8] sm:$0xff]  ;;  %v333_v26 = vld [vmem:[#allocation2 + $0x220] sm:$0xff] }
  0x1f   :  { %1697 = vmatpush3.msra.mxu1 %v110_v10  ;;  %v756_v47 = vsel %vm748_vm3, %v1607_v46, 0  ;;  %v1610_v6 = vcombine.high %v331_v2, %v331_v2  ;;  %v1612_v7 = vcombine.high %v332_v3, %v332_v3  ;;  %v1609_v8 = vcombine.low %v331_v2, %v331_v2  ;;  %v269_v10 = vld [vmem:[#allocation2 + $0x20] sm:$0xff]  ;;  %v318_v21 = vld [vmem:[#allocation2 + $0x1a8] sm:$0xff]  ;;  %v287_v35 = vld [vmem:[#allocation2 + $0xb0] sm:$0xff] }
  0x20   :  { %1710 = vmatpush3.msra.mxu0 %v190_v20  ;;  %845 = vmatprep.subr.bf16.mxu1 %v1542_v25  ;;  %v1611_v9 = vcombine.low %v332_v3, %v332_v3  ;;  %v1550_v16 = vcombine.high %v269_v10, %v285_v11  ;;  %v302_v20 = vld [vmem:[#allocation2 + $0x128] sm:$0xff]  ;;  %v1549_v22 = vcombine.low %v269_v10, %v285_v11  ;;  %v288_v37 = vld [vmem:[#allocation2 + $0xb8] sm:$0xff]  ;;  %v319_v43 = vld [vmem:[#allocation2 + $0x1b0] sm:$0xff] }
  0x21   :  { %886 = vmatprep.subr.bf16.mxu0 %v1544_v30  ;;  %v762_v14 = vsel %vm748_vm3, %v1609_v8, 0  ;;  %v1551_v23 = vcombine.low %v270_v12, %v286_v13  ;;  %v1584_v25 = vcombine.high %v302_v20, %v318_v21  ;;  %v334_v27 = vld [vmem:[#allocation2 + $0x228] sm:$0xff]  ;;  %v1614_v30 = vcombine.high %v333_v26, %v333_v26  ;;  %v335_v50 = vld [vmem:[#allocation2 + $0x230] sm:$0xff]  ;;  %v273_v59 = vld [vmem:[#allocation2 + $0x40] sm:$0xff] }
  0x22   :  { %v768_v15 = vsel %vm748_vm3, %v1611_v9, 0  ;;  %v1615_v33 = vcombine.low %v334_v27, %v334_v27  ;;  %v1617_v57 = vcombine.low %v335_v50, %v335_v50  ;;  %v289_v60 = vld [vmem:[#allocation2 + $0xc0] sm:$0xff] }
  0x23   :  { %v1558_v2 = vcombine.high %v273_v59, %v289_v60  ;;  %v1557_v8 = vcombine.low %v273_v59, %v289_v60 }
  0xe9   :  { %v101_v17 = vpop.f32.mrb[0].mxu0 }
  0xea   :  { %v105_v18 = vmax.f32 %v101_v17, 0.0  ;;  %v1687_v19 = vpop.f32.mrb[1].mxu0  ;;  %v1552_v17 = vcombine.high %v270_v12, %v286_v13  ;;  %v337_v12 = vld [vmem:[#allocation2 + $0x240] sm:$0xff]  ;;  %v338_v13 = vld [vmem:[#allocation2 + $0x248] sm:$0xff] }
  0xeb   :  { %v317_v19 = vld [vmem:[#allocation2 + $0x1a0] sm:$0xff] }
  0xec   :  { %1699 = vmatmul.mubr.msk.f32.vlgmr.msra.gmra.mrb[0].mxu1 %vm111_vm2, %v105_v18  ;;  %v301_v18 = vld [vmem:[#allocation2 + $0x120] sm:$0xff] }
  0xed   :  { %846 = vmatpush1.bf16.msra.mxu1 %v1541_v24  ;;  %877 = vmatprep.mubr.bf16.mxu1 %v1795_v56  ;;  %v1582_v24 = vcombine.high %v301_v18, %v317_v19  ;;  %v1581_v28 = vcombine.low %v301_v18, %v317_v19  ;;  %v1621_v18 = vcombine.low %v337_v12, %v337_v12 }
  0xee   :  { %847 = vmatprep.subr.bf16.mxu1 %v1574_v31  ;;  %v1616_v31 = vcombine.high %v334_v27, %v334_v27  ;;  %v1623_v19 = vcombine.low %v338_v13, %v338_v13 }
  0xf1   :  { %848 = vmatpush1.bf16.msra.mxu1 %v1573_v32  ;;  %v1613_v32 = vcombine.low %v333_v26, %v333_v26 }
  0xf2   :  { %1637 = vmatprep.subr.msk.bf16.mxu1 %vm748_vm3, %v1606_v34  ;;  %v271_v34 = vld [vmem:[#allocation2 + $0x30] sm:$0xff] }
  0xf3   :  { %v774_v38 = vsel %vm748_vm3, %v1613_v32, 0  ;;  %v1553_v46 = vcombine.low %v271_v34, %v287_v35 }
  0xf5   :  { %850 = vmatpush1.bf16.msra.mxu1 %v750_v36  ;;  %v272_v36 = vld [vmem:[#allocation2 + $0x38] sm:$0xff] }
  0xf6   :  { %927 = vmatprep.subr.bf16.mxu1 %v1546_v51  ;;  %v336_v51 = vld [vmem:[#allocation2 + $0x238] sm:$0xff] }
  0xf7   :  { %v1619_v58 = vcombine.low %v336_v51, %v336_v51 }
 0x1bf   :  { %v181_v39 = vpop.f32.mrb[0].mxu1 }
 0x1c0   :  { %v185_v40 = vmax.f32 %v181_v39, 0.0  ;;  %v1700_v41 = vpop.f32.mrb[1].mxu1  ;;  %v780_v39 = vsel %vm748_vm3, %v1615_v33, 0 }
 0x1c1   :  { %v1556_v41 = vcombine.high %v272_v36, %v288_v37 }
 0x1c2   :  { %1712 = vmatmul.mubr.msk.f32.vlgmr.msra.gmra.mrb[2].mxu0 %vm111_vm2, %v185_v40  ;;  %v1554_v40 = vcombine.high %v271_v34, %v287_v35 }
 0x1c3   :  { %887 = vmatpush1.bf16.msra.mxu0 %v1543_v29  ;;  %918 = vmatprep.mubr.bf16.mxu0 %v1795_v56  ;;  %v1583_v29 = vcombine.low %v302_v20, %v318_v21  ;;  %v275_v20 = vld [vmem:[#allocation2 + $0x50] sm:$0xff] }
 0x1c4   :  { %888 = vmatprep.subr.bf16.mxu0 %v1576_v42  ;;  %v303_v42 = vld [vmem:[#allocation2 + $0x130] sm:$0xff] }
 0x1c5   :  { %v1586_v48 = vcombine.high %v303_v42, %v319_v43  ;;  %v1585_v52 = vcombine.low %v303_v42, %v319_v43  ;;  %v291_v21 = vld [vmem:[#allocation2 + $0xd0] sm:$0xff] }
 0x1c6   :  { %v1562_v26 = vcombine.high %v275_v20, %v291_v21  ;;  %v1561_v32 = vcombine.low %v275_v20, %v291_v21 }
 0x1c7   :  { %889 = vmatpush1.bf16.msra.mxu0 %v1575_v44  ;;  %v304_v44 = vld [vmem:[#allocation2 + $0x138] sm:$0xff] }
 0x1c8   :  { %1639 = vmatprep.subr.msk.bf16.mxu0 %vm748_vm3, %v1608_v45  ;;  %v320_v45 = vld [vmem:[#allocation2 + $0x1b8] sm:$0xff] }
 0x1c9   :  { %v1588_v49 = vcombine.high %v304_v44, %v320_v45 }
 0x1cb   :  { %891 = vmatpush1.bf16.msra.mxu0 %v756_v47  ;;  %v1555_v47 = vcombine.low %v272_v36, %v288_v37  ;;  %v339_v36 = vld [vmem:[#allocation2 + $0x250] sm:$0xff]  ;;  %v340_v37 = vld [vmem:[#allocation2 + $0x258] sm:$0xff] }
 0x1cc   :  { %968 = vmatprep.subr.bf16.mxu0 %v1548_v55  ;;  %v1620_v55 = vcombine.high %v336_v51, %v336_v51  ;;  %v1625_v42 = vcombine.low %v339_v36, %v339_v36  ;;  %v1627_v43 = vcombine.low %v340_v37, %v340_v37 }
 0x295   :  { %v260_v61 = vpop.f32.mrb[2].mxu0 }
 0x296   :  { %v1875_v62 = vpack.c.bf16 %v260_v61, %v260_v61  ;;  %v1713_v63 = vpop.f32.mrb[3].mxu0  ;;  %v274_v61 = vld [vmem:[#allocation2 + $0x48] sm:$0xff] }
 0x297   :  { %v290_v63 = vld [vmem:[#allocation2 + $0xc8] sm:$0xff] }
 0x298   :  { %1638 = vmatmul.mubr.msk.bf16.vlgmr.msra.gmra.mrb[4].mxu1 %vm111_vm2, %v1875_v62  ;;  %1640 = vmatmul.mubr.msk.bf16.vlgmr.msra.gmra.mrb[4].mxu0 %vm111_vm2, %v1875_v62  ;;  %v1560_v3 = vcombine.high %v274_v61, %v290_v63  ;;  %v1559_v9 = vcombine.low %v274_v61, %v290_v63  ;;  %v341_v61 = vld [vmem:[#allocation2 + $0x260] sm:$0xff]  ;;  %v342_v63 = vld [vmem:[#allocation2 + $0x268] sm:$0xff] }
 0x299   :  { %928 = vmatpush1.bf16.msra.mxu1 %v1545_v53  ;;  %969 = vmatpush1.bf16.msra.mxu0 %v1547_v54  ;;  %v1587_v53 = vcombine.low %v304_v44, %v320_v45  ;;  %v1618_v54 = vcombine.high %v335_v50, %v335_v50  ;;  %v277_v44 = vld [vmem:[#allocation2 + $0x60] sm:$0xff] }
 0x29a   :  { %929 = vmatprep.subr.bf16.mxu1 %v1578_v0  ;;  %970 = vmatprep.subr.bf16.mxu0 %v1580_v1  ;;  %v786_v0 = vsel %vm748_vm3, %v1617_v57, 0  ;;  %v792_v1 = vsel %vm748_vm3, %v1619_v58, 0  ;;  %v293_v45 = vld [vmem:[#allocation2 + $0xe0] sm:$0xff] }
 0x29b   :  { %959 = vmatprep.mubr.bf16.mxu1 %v1795_v56  ;;  %1000 = vmatprep.mubr.bf16.mxu0 %v1795_v56  ;;  %v1566_v50 = vcombine.high %v277_v44, %v293_v45  ;;  %v1565_v57 = vcombine.low %v277_v44, %v293_v45 }
 0x29d   :  { %930 = vmatpush1.bf16.msra.mxu1 %v1577_v4  ;;  %971 = vmatpush1.bf16.msra.mxu0 %v1579_v5  ;;  %v305_v4 = vld [vmem:[#allocation2 + $0x140] sm:$0xff] }
 0x29e   :  { %1641 = vmatprep.subr.msk.bf16.mxu1 %vm748_vm3, %v1610_v6  ;;  %1643 = vmatprep.subr.msk.bf16.mxu0 %vm748_vm3, %v1612_v7  ;;  %v321_v5 = vld [vmem:[#allocation2 + $0x1c0] sm:$0xff]  ;;  %v306_v6 = vld [vmem:[#allocation2 + $0x148] sm:$0xff] }
 0x29f   :  { %v322_v7 = vld [vmem:[#allocation2 + $0x1c8] sm:$0xff]  ;;  %v1590_v10 = vcombine.high %v305_v4, %v321_v5 }
 0x2a0   :  { %v1592_v11 = vcombine.high %v306_v6, %v322_v7 }
 0x2a1   :  { %932 = vmatpush1.bf16.msra.mxu1 %v762_v14  ;;  %973 = vmatpush1.bf16.msra.mxu0 %v768_v15  ;;  %v1589_v14 = vcombine.low %v305_v4, %v321_v5  ;;  %v1591_v15 = vcombine.low %v306_v6, %v322_v7  ;;  %v1629_v4 = vcombine.low %v341_v61, %v341_v61  ;;  %v279_v6 = vld [vmem:[#allocation2 + $0x70] sm:$0xff] }
 0x2a2   :  { %1009 = vmatprep.subr.bf16.mxu1 %v1550_v16  ;;  %1050 = vmatprep.subr.bf16.mxu0 %v1552_v17  ;;  %v1622_v16 = vcombine.high %v337_v12, %v337_v12  ;;  %v1624_v17 = vcombine.high %v338_v13, %v338_v13  ;;  %v1631_v5 = vcombine.low %v342_v63, %v342_v63  ;;  %v295_v7 = vld [vmem:[#allocation2 + $0xf0] sm:$0xff] }
 0x2a3   :  { %v1570_v12 = vcombine.high %v279_v6, %v295_v7 }
 0x2a4   :  { %1642 = vmatmul.mubr.msk.bf16.vlgmr.msra.gmra.mrb[8].mxu1 %vm111_vm2, %v1875_v62  ;;  %1644 = vmatmul.mubr.msk.bf16.vlgmr.msra.gmra.mrb[8].mxu0 %vm111_vm2, %v1875_v62 }
 0x2a5   :  { %1010 = vmatpush1.bf16.msra.mxu1 %v1549_v22  ;;  %1051 = vmatpush1.bf16.msra.mxu0 %v1551_v23  ;;  %v276_v22 = vld [vmem:[#allocation2 + $0x58] sm:$0xff] }
 0x2a6   :  { %1011 = vmatprep.subr.bf16.mxu1 %v1582_v24  ;;  %1052 = vmatprep.subr.bf16.mxu0 %v1584_v25  ;;  %v292_v23 = vld [vmem:[#allocation2 + $0xd8] sm:$0xff]  ;;  %v798_v24 = vsel %vm748_vm3, %v1621_v18, 0  ;;  %v804_v25 = vsel %vm748_vm3, %v1623_v19, 0  ;;  %v1569_v18 = vcombine.low %v279_v6, %v295_v7 }
 0x2a7   :  { %1041 = vmatprep.mubr.bf16.mxu1 %v1795_v56  ;;  %1082 = vmatprep.mubr.bf16.mxu0 %v1795_v56  ;;  %v1564_v27 = vcombine.high %v276_v22, %v292_v23  ;;  %v1563_v33 = vcombine.low %v276_v22, %v292_v23  ;;  %v343_v22 = vld [vmem:[#allocation2 + $0x270] sm:$0xff]  ;;  %v344_v23 = vld [vmem:[#allocation2 + $0x278] sm:$0xff] }
 0x2a9   :  { %1012 = vmatpush1.bf16.msra.mxu1 %v1581_v28  ;;  %1053 = vmatpush1.bf16.msra.mxu0 %v1583_v29  ;;  %v307_v28 = vld [vmem:[#allocation2 + $0x150] sm:$0xff] }
 0x2aa   :  { %1645 = vmatprep.subr.msk.bf16.mxu1 %vm748_vm3, %v1614_v30  ;;  %1647 = vmatprep.subr.msk.bf16.mxu0 %vm748_vm3, %v1616_v31  ;;  %v323_v29 = vld [vmem:[#allocation2 + $0x1d0] sm:$0xff]  ;;  %v308_v30 = vld [vmem:[#allocation2 + $0x158] sm:$0xff] }
 0x2ab   :  { %v324_v31 = vld [vmem:[#allocation2 + $0x1d8] sm:$0xff]  ;;  %v1594_v34 = vcombine.high %v307_v28, %v323_v29 }
 0x2ac   :  { %v1596_v35 = vcombine.high %v308_v30, %v324_v31 }
 0x2ad   :  { %1014 = vmatpush1.bf16.msra.mxu1 %v774_v38  ;;  %1055 = vmatpush1.bf16.msra.mxu0 %v780_v39  ;;  %v1593_v38 = vcombine.low %v307_v28, %v323_v29  ;;  %v1595_v39 = vcombine.low %v308_v30, %v324_v31  ;;  %v1633_v28 = vcombine.low %v343_v22, %v343_v22 }
 0x2ae   :  { %1091 = vmatprep.subr.bf16.mxu1 %v1554_v40  ;;  %1132 = vmatprep.subr.bf16.mxu0 %v1556_v41  ;;  %v1626_v40 = vcombine.high %v339_v36, %v339_v36  ;;  %v1628_v41 = vcombine.high %v340_v37, %v340_v37  ;;  %v1635_v29 = vcombine.low %v344_v23, %v344_v23 }
 0x2af   :  { %v834_v30 = vsel %vm748_vm3, %v1633_v28, 0 }
 0x2b0   :  { %1646 = vmatmul.mubr.msk.bf16.vlgmr.msra.gmra.mrb[12].mxu1 %vm111_vm2, %v1875_v62  ;;  %1648 = vmatmul.mubr.msk.bf16.vlgmr.msra.gmra.mrb[12].mxu0 %vm111_vm2, %v1875_v62  ;;  %v840_v31 = vsel %vm748_vm3, %v1635_v29, 0 }
 0x2b1   :  { %1092 = vmatpush1.bf16.msra.mxu1 %v1553_v46  ;;  %1133 = vmatpush1.bf16.msra.mxu0 %v1555_v47  ;;  %v278_v46 = vld [vmem:[#allocation2 + $0x68] sm:$0xff] }
 0x2b2   :  { %1093 = vmatprep.subr.bf16.mxu1 %v1586_v48  ;;  %1134 = vmatprep.subr.bf16.mxu0 %v1588_v49  ;;  %v294_v47 = vld [vmem:[#allocation2 + $0xe8] sm:$0xff]  ;;  %v810_v48 = vsel %vm748_vm3, %v1625_v42, 0  ;;  %v816_v49 = vsel %vm748_vm3, %v1627_v43, 0 }
 0x2b3   :  { %1123 = vmatprep.mubr.bf16.mxu1 %v1795_v56  ;;  %1164 = vmatprep.mubr.bf16.mxu0 %v1795_v56  ;;  %v1568_v51 = vcombine.high %v278_v46, %v294_v47  ;;  %v1567_v58 = vcombine.low %v278_v46, %v294_v47 }
 0x2b5   :  { %1094 = vmatpush1.bf16.msra.mxu1 %v1585_v52  ;;  %1135 = vmatpush1.bf16.msra.mxu0 %v1587_v53  ;;  %v309_v52 = vld [vmem:[#allocation2 + $0x160] sm:$0xff] }
 0x2b6   :  { %1649 = vmatprep.subr.msk.bf16.mxu1 %vm748_vm3, %v1618_v54  ;;  %1651 = vmatprep.subr.msk.bf16.mxu0 %vm748_vm3, %v1620_v55  ;;  %v325_v53 = vld [vmem:[#allocation2 + $0x1e0] sm:$0xff]  ;;  %v310_v54 = vld [vmem:[#allocation2 + $0x168] sm:$0xff] }
 0x2b7   :  { %v326_v55 = vld [vmem:[#allocation2 + $0x1e8] sm:$0xff]  ;;  %v1598_v59 = vcombine.high %v309_v52, %v325_v53 }
 0x2b8   :  { %v1600_v60 = vcombine.high %v310_v54, %v326_v55 }
 0x2b9   :  { %1096 = vmatpush1.bf16.msra.mxu1 %v786_v0  ;;  %1137 = vmatpush1.bf16.msra.mxu0 %v792_v1  ;;  %v1597_v0 = vcombine.low %v309_v52, %v325_v53  ;;  %v1599_v1 = vcombine.low %v310_v54, %v326_v55 }
 0x2ba   :  { %1173 = vmatprep.subr.bf16.mxu1 %v1558_v2  ;;  %1214 = vmatprep.subr.bf16.mxu0 %v1560_v3  ;;  %v1630_v2 = vcombine.high %v341_v61, %v341_v61  ;;  %v1632_v3 = vcombine.high %v342_v63, %v342_v63 }
 0x2bc   :  { %1650 = vmatmul.mubr.msk.bf16.vlgmr.msra.gmra.mrb[16].mxu1 %vm111_vm2, %v1875_v62  ;;  %1652 = vmatmul.mubr.msk.bf16.vlgmr.msra.gmra.mrb[16].mxu0 %vm111_vm2, %v1875_v62 }
 0x2bd   :  { %1174 = vmatpush1.bf16.msra.mxu1 %v1557_v8  ;;  %1215 = vmatpush1.bf16.msra.mxu0 %v1559_v9  ;;  %v280_v8 = vld [vmem:[#allocation2 + $0x78] sm:$0xff] }
 0x2be   :  { %1175 = vmatprep.subr.bf16.mxu1 %v1590_v10  ;;  %1216 = vmatprep.subr.bf16.mxu0 %v1592_v11  ;;  %v296_v9 = vld [vmem:[#allocation2 + $0xf8] sm:$0xff]  ;;  %v822_v10 = vsel %vm748_vm3, %v1629_v4, 0  ;;  %v828_v11 = vsel %vm748_vm3, %v1631_v5, 0 }
 0x2bf   :  { %1205 = vmatprep.mubr.bf16.mxu1 %v1795_v56  ;;  %1246 = vmatprep.mubr.bf16.mxu0 %v1795_v56  ;;  %v1572_v13 = vcombine.high %v280_v8, %v296_v9  ;;  %v1571_v19 = vcombine.low %v280_v8, %v296_v9 }
 0x2c1   :  { %1176 = vmatpush1.bf16.msra.mxu1 %v1589_v14  ;;  %1217 = vmatpush1.bf16.msra.mxu0 %v1591_v15  ;;  %v311_v14 = vld [vmem:[#allocation2 + $0x170] sm:$0xff] }
 0x2c2   :  { %1653 = vmatprep.subr.msk.bf16.mxu1 %vm748_vm3, %v1622_v16  ;;  %1655 = vmatprep.subr.msk.bf16.mxu0 %vm748_vm3, %v1624_v17  ;;  %v327_v15 = vld [vmem:[#allocation2 + $0x1f0] sm:$0xff]  ;;  %v312_v16 = vld [vmem:[#allocation2 + $0x178] sm:$0xff] }
 0x2c3   :  { %v328_v17 = vld [vmem:[#allocation2 + $0x1f8] sm:$0xff]  ;;  %v1602_v20 = vcombine.high %v311_v14, %v327_v15 }
 0x2c4   :  { %v1604_v21 = vcombine.high %v312_v16, %v328_v17 }
 0x2c5   :  { %1178 = vmatpush1.bf16.msra.mxu1 %v798_v24  ;;  %1219 = vmatpush1.bf16.msra.mxu0 %v804_v25  ;;  %v1601_v24 = vcombine.low %v311_v14, %v327_v15  ;;  %v1603_v25 = vcombine.low %v312_v16, %v328_v17 }
 0x2c6   :  { %1255 = vmatprep.subr.bf16.mxu1 %v1562_v26  ;;  %1296 = vmatprep.subr.bf16.mxu0 %v1564_v27  ;;  %v1634_v26 = vcombine.high %v343_v22, %v343_v22  ;;  %v1636_v27 = vcombine.high %v344_v23, %v344_v23 }
 0x2c8   :  { %1654 = vmatmul.mubr.msk.bf16.vlgmr.msra.gmra.mrb[20].mxu1 %vm111_vm2, %v1875_v62  ;;  %1656 = vmatmul.mubr.msk.bf16.vlgmr.msra.gmra.mrb[20].mxu0 %vm111_vm2, %v1875_v62 }
 0x2c9   :  { %1256 = vmatpush1.bf16.msra.mxu1 %v1561_v32  ;;  %1297 = vmatpush1.bf16.msra.mxu0 %v1563_v33 }
 0x2ca   :  { %1257 = vmatprep.subr.bf16.mxu1 %v1594_v34  ;;  %1298 = vmatprep.subr.bf16.mxu0 %v1596_v35 }
 0x2cb   :  { %1287 = vmatprep.mubr.bf16.mxu1 %v1795_v56  ;;  %1328 = vmatprep.mubr.bf16.mxu0 %v1795_v56 }
 0x2cd   :  { %1258 = vmatpush1.bf16.msra.mxu1 %v1593_v38  ;;  %1299 = vmatpush1.bf16.msra.mxu0 %v1595_v39 }
 0x2ce   :  { %1657 = vmatprep.subr.msk.bf16.mxu1 %vm748_vm3, %v1626_v40  ;;  %1659 = vmatprep.subr.msk.bf16.mxu0 %vm748_vm3, %v1628_v41 }
 0x2d1   :  { %1260 = vmatpush1.bf16.msra.mxu1 %v810_v48  ;;  %1301 = vmatpush1.bf16.msra.mxu0 %v816_v49 }
 0x2d2   :  { %1337 = vmatprep.subr.bf16.mxu1 %v1566_v50  ;;  %1378 = vmatprep.subr.bf16.mxu0 %v1568_v51 }
 0x2d4   :  { %1658 = vmatmul.mubr.msk.bf16.vlgmr.msra.gmra.mrb[24].mxu1 %vm111_vm2, %v1875_v62  ;;  %1660 = vmatmul.mubr.msk.bf16.vlgmr.msra.gmra.mrb[24].mxu0 %vm111_vm2, %v1875_v62 }
 0x2d5   :  { %1338 = vmatpush1.bf16.msra.mxu1 %v1565_v57  ;;  %1379 = vmatpush1.bf16.msra.mxu0 %v1567_v58 }
 0x2d6   :  { %1339 = vmatprep.subr.bf16.mxu1 %v1598_v59  ;;  %1380 = vmatprep.subr.bf16.mxu0 %v1600_v60 }
 0x2d7   :  { %1369 = vmatprep.mubr.bf16.mxu1 %v1795_v56  ;;  %1410 = vmatprep.mubr.bf16.mxu0 %v1795_v56 }
 0x2d9   :  { %1340 = vmatpush1.bf16.msra.mxu1 %v1597_v0  ;;  %1381 = vmatpush1.bf16.msra.mxu0 %v1599_v1 }
 0x2da   :  { %1661 = vmatprep.subr.msk.bf16.mxu1 %vm748_vm3, %v1630_v2  ;;  %1663 = vmatprep.subr.msk.bf16.mxu0 %vm748_vm3, %v1632_v3 }
 0x2dd   :  { %1342 = vmatpush1.bf16.msra.mxu1 %v822_v10  ;;  %1383 = vmatpush1.bf16.msra.mxu0 %v828_v11 }
 0x2de   :  { %1419 = vmatprep.subr.bf16.mxu1 %v1570_v12  ;;  %1460 = vmatprep.subr.bf16.mxu0 %v1572_v13 }
 0x2e0   :  { %1662 = vmatmul.mubr.msk.bf16.vlgmr.msra.gmra.mrb[28].mxu1 %vm111_vm2, %v1875_v62  ;;  %1664 = vmatmul.mubr.msk.bf16.vlgmr.msra.gmra.mrb[28].mxu0 %vm111_vm2, %v1875_v62 }
 0x2e1   :  { %1420 = vmatpush1.bf16.msra.mxu1 %v1569_v18  ;;  %1461 = vmatpush1.bf16.msra.mxu0 %v1571_v19 }
 0x2e2   :  { %1421 = vmatprep.subr.bf16.mxu1 %v1602_v20  ;;  %1462 = vmatprep.subr.bf16.mxu0 %v1604_v21 }
 0x2e3   :  { %1451 = vmatprep.mubr.bf16.mxu1 %v1795_v56  ;;  %1492 = vmatprep.mubr.bf16.mxu0 %v1795_v56 }
 0x2e5   :  { %1422 = vmatpush1.bf16.msra.mxu1 %v1601_v24  ;;  %1463 = vmatpush1.bf16.msra.mxu0 %v1603_v25 }
 0x2e6   :  { %1665 = vmatprep.subr.msk.bf16.mxu1 %vm748_vm3, %v1634_v26  ;;  %1667 = vmatprep.subr.msk.bf16.mxu0 %vm748_vm3, %v1636_v27 }
 0x2e9   :  { %1424 = vmatpush1.bf16.msra.mxu1 %v834_v30  ;;  %1465 = vmatpush1.bf16.msra.mxu0 %v840_v31 }
 0x2ec   :  { %1666 = vmatmul.mubr.msk.bf16.vlgmr.msra.gmra.mrb[32].mxu1 %vm111_vm2, %v1875_v62  ;;  %1668 = vmatmul.mubr.msk.bf16.vlgmr.msra.gmra.mrb[32].mxu0 %vm111_vm2, %v1875_v62 }
 0x36b   :  { %v879_v32 = vpop.f32.mrb[4].mxu1  ;;  %v920_v56 = vpop.f32.mrb[4].mxu0 }
 0x36c   :  { %1501 = vst [vmem:[%s2050_s3] sm:$0xff] %v879_v32  ;;  %1503 = vst [vmem:[%s2050_s3 + $0x10] sm:$0xff] %v920_v56  ;;  %v881_v33 = vpop.f32.mrb[5].mxu1  ;;  %v922_v34 = vpop.f32.mrb[5].mxu0 }
 0x36d   :  { %1502 = vst [vmem:[%s2050_s3 + $0x8] sm:$0xff] %v881_v33  ;;  %1504 = vst [vmem:[%s2050_s3 + $0x18] sm:$0xff] %v922_v34  ;;  %v883_v62 = vpop.f32.mrb[6].mxu1  ;;  %v924_v35 = vpop.f32.mrb[6].mxu0 }
 0x36e   :  { %v884_v36 = vpop.f32.mrb[7].mxu1  ;;  %v925_v37 = vpop.f32.mrb[7].mxu0 }
 0x377   :  { %v961_v38 = vpop.f32.mrb[8].mxu1  ;;  %v1002_v39 = vpop.f32.mrb[8].mxu0 }
 0x378   :  { %1505 = vst [vmem:[%s2050_s3 + $0x20] sm:$0xff] %v961_v38  ;;  %1507 = vst [vmem:[%s2050_s3 + $0x30] sm:$0xff] %v1002_v39  ;;  %v963_v40 = vpop.f32.mrb[9].mxu1  ;;  %v1004_v41 = vpop.f32.mrb[9].mxu0 }
 0x379   :  { %1506 = vst [vmem:[%s2050_s3 + $0x28] sm:$0xff] %v963_v40  ;;  %1508 = vst [vmem:[%s2050_s3 + $0x38] sm:$0xff] %v1004_v41  ;;  %v965_v42 = vpop.f32.mrb[10].mxu1  ;;  %v1006_v43 = vpop.f32.mrb[10].mxu0 }
 0x37a   :  { %v966_v44 = vpop.f32.mrb[11].mxu1  ;;  %v1007_v45 = vpop.f32.mrb[11].mxu0 }
 0x383   :  { %v1043_v46 = vpop.f32.mrb[12].mxu1  ;;  %v1084_v47 = vpop.f32.mrb[12].mxu0 }
 0x384   :  { %1509 = vst [vmem:[%s2050_s3 + $0x40] sm:$0xff] %v1043_v46  ;;  %1511 = vst [vmem:[%s2050_s3 + $0x50] sm:$0xff] %v1084_v47  ;;  %v1045_v48 = vpop.f32.mrb[13].mxu1  ;;  %v1086_v49 = vpop.f32.mrb[13].mxu0 }
 0x385   :  { %1510 = vst [vmem:[%s2050_s3 + $0x48] sm:$0xff] %v1045_v48  ;;  %1512 = vst [vmem:[%s2050_s3 + $0x58] sm:$0xff] %v1086_v49  ;;  %v1047_v50 = vpop.f32.mrb[14].mxu1  ;;  %v1088_v51 = vpop.f32.mrb[14].mxu0 }
 0x386   :  { %v1048_v52 = vpop.f32.mrb[15].mxu1  ;;  %v1089_v53 = vpop.f32.mrb[15].mxu0 }
 0x38f   :  { %v1125_v54 = vpop.f32.mrb[16].mxu1  ;;  %v1166_v55 = vpop.f32.mrb[16].mxu0 }
 0x390   :  { %1513 = vst [vmem:[%s2050_s3 + $0x60] sm:$0xff] %v1125_v54  ;;  %1515 = vst [vmem:[%s2050_s3 + $0x70] sm:$0xff] %v1166_v55  ;;  %v1127_v57 = vpop.f32.mrb[17].mxu1  ;;  %v1168_v58 = vpop.f32.mrb[17].mxu0 }
 0x391   :  { %1514 = vst [vmem:[%s2050_s3 + $0x68] sm:$0xff] %v1127_v57  ;;  %1516 = vst [vmem:[%s2050_s3 + $0x78] sm:$0xff] %v1168_v58  ;;  %v1129_v59 = vpop.f32.mrb[18].mxu1  ;;  %v1170_v60 = vpop.f32.mrb[18].mxu0 }
 0x392   :  { %v1130_v61 = vpop.f32.mrb[19].mxu1  ;;  %v1171_v63 = vpop.f32.mrb[19].mxu0 }
 0x39b   :  { %v1207_v0 = vpop.f32.mrb[20].mxu1  ;;  %v1248_v1 = vpop.f32.mrb[20].mxu0 }
 0x39c   :  { %1517 = vst [vmem:[%s2050_s3 + $0x80] sm:$0xff] %v1207_v0  ;;  %1519 = vst [vmem:[%s2050_s3 + $0x90] sm:$0xff] %v1248_v1  ;;  %v1209_v2 = vpop.f32.mrb[21].mxu1  ;;  %v1250_v3 = vpop.f32.mrb[21].mxu0 }
 0x39d   :  { %1518 = vst [vmem:[%s2050_s3 + $0x88] sm:$0xff] %v1209_v2  ;;  %1520 = vst [vmem:[%s2050_s3 + $0x98] sm:$0xff] %v1250_v3  ;;  %v1211_v4 = vpop.f32.mrb[22].mxu1  ;;  %v1252_v5 = vpop.f32.mrb[22].mxu0 }
 0x39e   :  { %v1212_v6 = vpop.f32.mrb[23].mxu1  ;;  %v1253_v7 = vpop.f32.mrb[23].mxu0 }
 0x3a7   :  { %v1289_v8 = vpop.f32.mrb[24].mxu1  ;;  %v1330_v9 = vpop.f32.mrb[24].mxu0 }
 0x3a8   :  { %1521 = vst [vmem:[%s2050_s3 + $0xa0] sm:$0xff] %v1289_v8  ;;  %1523 = vst [vmem:[%s2050_s3 + $0xb0] sm:$0xff] %v1330_v9  ;;  %v1291_v10 = vpop.f32.mrb[25].mxu1  ;;  %v1332_v11 = vpop.f32.mrb[25].mxu0 }
 0x3a9   :  { %1522 = vst [vmem:[%s2050_s3 + $0xa8] sm:$0xff] %v1291_v10  ;;  %1524 = vst [vmem:[%s2050_s3 + $0xb8] sm:$0xff] %v1332_v11  ;;  %v1293_v12 = vpop.f32.mrb[26].mxu1  ;;  %v1334_v13 = vpop.f32.mrb[26].mxu0 }
 0x3aa   :  { %v1294_v14 = vpop.f32.mrb[27].mxu1  ;;  %v1335_v15 = vpop.f32.mrb[27].mxu0 }
 0x3b3   :  { %v1371_v16 = vpop.f32.mrb[28].mxu1  ;;  %v1412_v17 = vpop.f32.mrb[28].mxu0 }
 0x3b4   :  { %1525 = vst [vmem:[%s2050_s3 + $0xc0] sm:$0xff] %v1371_v16  ;;  %1527 = vst [vmem:[%s2050_s3 + $0xd0] sm:$0xff] %v1412_v17  ;;  %v1373_v18 = vpop.f32.mrb[29].mxu1  ;;  %v1414_v19 = vpop.f32.mrb[29].mxu0 }
 0x3b5   :  { %1526 = vst [vmem:[%s2050_s3 + $0xc8] sm:$0xff] %v1373_v18  ;;  %1528 = vst [vmem:[%s2050_s3 + $0xd8] sm:$0xff] %v1414_v19  ;;  %v1375_v20 = vpop.f32.mrb[30].mxu1  ;;  %v1416_v21 = vpop.f32.mrb[30].mxu0 }
 0x3b6   :  { %v1376_v22 = vpop.f32.mrb[31].mxu1  ;;  %v1417_v23 = vpop.f32.mrb[31].mxu0 }
 0x3bf   :  { %v1453_v24 = vpop.f32.mrb[32].mxu1  ;;  %v1494_v25 = vpop.f32.mrb[32].mxu0 }
 0x3c0   :  { %1529 = vst [vmem:[%s2050_s3 + $0xe0] sm:$0xff] %v1453_v24  ;;  %1531 = vst [vmem:[%s2050_s3 + $0xf0] sm:$0xff] %v1494_v25  ;;  %v1455_v26 = vpop.f32.mrb[33].mxu1  ;;  %v1496_v27 = vpop.f32.mrb[33].mxu0 }
 0x3c1   :  { %1530 = vst [vmem:[%s2050_s3 + $0xe8] sm:$0xff] %v1455_v26  ;;  %1532 = vst [vmem:[%s2050_s3 + $0xf8] sm:$0xff] %v1496_v27  ;;  %v1457_v28 = vpop.f32.mrb[34].mxu1  ;;  %v1498_v29 = vpop.f32.mrb[34].mxu0 }
 0x3c2   :  { %v1458_v30 = vpop.f32.mrb[35].mxu1  ;;  %v1499_v31 = vpop.f32.mrb[35].mxu0 }
 0x3c3   :  { %1537 = vsyncpa [#allocation3], 1 }

</bundles_post_ra>
